<compile_context>
chip_gen: v7x
topology: tpu7x:2x2x1
jax: 0.10.0
libtpu: 0.0.40
codegen_flags: <defaults>
</compile_context>

<pallas_src>
import functools

import jax
import jax.numpy as jnp
from jax import lax
from jax.experimental import pallas as pl
from jax.experimental.pallas import tpu as pltpu


def _loss_mep_kernel(o_ref, t_ref, out_ref, acc_sq_ref, acc_tv_ref, *,
                     alpha, inv_n_mse, inv_n_tv, h, w, l, tile_rows):
    k = pl.program_id(1)

    @pl.when(k == 0)
    def _init():
        acc_sq_ref[...] = jnp.zeros_like(acc_sq_ref)
        acc_tv_ref[...] = jnp.zeros_like(acc_tv_ref)

    o = o_ref[...].astype(jnp.float32)   # (tile_rows, L) lane-dense tile
    t = t_ref[...].astype(jnp.float32)

    # --- squared-error terms -------------------------------------------------
    d = o - t
    sq_terms = d * d

    # --- total-variation terms -----------------------------------------------
    # Each row is one (b, c) image flattened row-major: width neighbour of flat
    # index c is c+1, height neighbour is c+w.  pltpu.roll(x, L - s, axis=1)
    # == np.roll(x, -s, axis=1): XLU lane rotation, no strided relayouts.
    o_w = pltpu.roll(o, shift=l - 1, axis=1)   # o_w[:, c] == o[:, (c + 1) % L]
    o_h = pltpu.roll(o, shift=l - w, axis=1)   # o_h[:, c] == o[:, (c + w) % L]

    # Validity masks built in-kernel (cheap VPU work hidden under the DMA):
    #   width pair (c, c+1) valid iff c is not the last column of its image row
    #   height pair (c, c+w) valid iff c is not in the last image row
    cols = lax.broadcasted_iota(jnp.int32, (1, l), 1)
    m_w = (cols % w) != (w - 1)
    m_h = cols < (h - 1) * w
    tv_terms = (jnp.where(m_w, jnp.abs(o - o_w), 0.0)
                + jnp.where(m_h, jnp.abs(o - o_h), 0.0))

    # --- lane-parallel accumulate (VPU-only on the per-step path) ------------
    g = tile_rows // 8
    if g == 1:
        acc_sq_ref[...] += sq_terms
        acc_tv_ref[...] += tv_terms
    else:
        # (tile_rows, L) -> (g, 8, L): splits the sublane dim on tile
        # boundaries (layout-preserving); sum over the untiled leading axis.
        acc_sq_ref[...] += jnp.sum(sq_terms.reshape(g, 8, l), axis=0)
        acc_tv_ref[...] += jnp.sum(tv_terms.reshape(g, 8, l), axis=0)

    # --- per-half epilogue: single full reduction + alpha mix -----------------
    @pl.when(k == pl.num_programs(1) - 1)
    def _finalize():
        sq_sum = jnp.sum(acc_sq_ref[...])
        tv_sum = jnp.sum(acc_tv_ref[...])
        part = (1.0 - alpha) * sq_sum * inv_n_mse + alpha * tv_sum * inv_n_tv
        out_ref[...] = jnp.zeros_like(out_ref) + part


def _round_up(x, m):
    return ((x + m - 1) // m) * m


def _device_budgets():
    """(per-input tile budget bytes, scoped vmem limit bytes) by generation."""
    try:
        kind = jax.devices()[0].device_kind.lower()
    except Exception:  # pragma: no cover - defensive fallback
        kind = ""
    if "v7" in kind:
        # v7x: 64 MiB VMEM per TensorCore -> smaller tiles, modest scoped limit.
        return 2 << 20, 48 << 20
    # v5e / v6e: 128 MiB VMEM -> bigger tiles, raise the scoped limit.
    return 4 << 20, 64 << 20


def _plan_tiling(bc, l, itemsize, budget_bytes):
    """Pick (num_splits, steps, tile_rows, padded B*C)."""
    elem = max(itemsize, 4)  # count the in-kernel f32 upcast against the budget
    budget_rows = max(8, (budget_bytes // max(1, l * elem)) // 8 * 8)
    num_splits = 2 if bc >= 32 else 1            # dual-TensorCore halves (v7x)
    half = _round_up(-(-bc // num_splits), 8)    # rows per half, multiple of 8
    steps = max(1, -(-half // budget_rows))      # reduction steps per half
    tile_rows = _round_up(-(-half // steps), 8)  # <= budget_rows by construction
    half_pad = steps * tile_rows
    return num_splits, steps, tile_rows, num_splits * half_pad


def loss_mep(output, target, alpha=0.1, *, tile_budget_bytes=None):
    """Pallas implementation of LossMEP.forward(output, target) -> scalar."""
    assert output.shape == target.shape and output.ndim == 4
    b, c, h, w = output.shape
    bc, l = b * c, h * w

    budget, vmem_limit = _device_budgets()
    if tile_budget_bytes is not None:
        budget = tile_budget_bytes

    num_splits, steps, tile_rows, bc_pad = _plan_tiling(
        bc, l, output.dtype.itemsize, budget)

    # Lane-dense view: one flattened (H*W) image per row.  Pure reshape.
    o2 = output.reshape(bc, l)
    t2 = target.reshape(bc, l)
    if bc_pad != bc:
        # Zero rows contribute 0 to both the squared-error and TV sums.
        o2 = jnp.pad(o2, ((0, bc_pad - bc), (0, 0)))
        t2 = jnp.pad(t2, ((0, bc_pad - bc), (0, 0)))

    kernel = functools.partial(
        _loss_mep_kernel,
        alpha=float(alpha),
        inv_n_mse=1.0 / float(b * c * h * w),
        inv_n_tv=1.0 / float(b * h * w),
        h=h, w=w, l=l, tile_rows=tile_rows)

    row_map = lambda p, k: (p * steps + k, 0)

    cost = pl.CostEstimate(
        flops=11 * bc * l,
        transcendentals=0,
        bytes_accessed=2 * bc_pad * l * output.dtype.itemsize
                       + num_splits * 8 * 128 * 4)

    res = pl.pallas_call(
        kernel,
        out_shape=jax.ShapeDtypeStruct((num_splits, 8, 128), jnp.float32),
        grid_spec=pltpu.PrefetchScalarGridSpec(
            num_scalar_prefetch=0,
            grid=(num_splits, steps),
            in_specs=[
                pl.BlockSpec((tile_rows, l), row_map),   # output tile
                pl.BlockSpec((tile_rows, l), row_map),   # target tile
            ],
            # One lane-dense output block per parallel half; written once in
            # the per-half epilogue.
            out_specs=pl.BlockSpec((1, 8, 128), lambda p, k: (p, 0, 0)),
            scratch_shapes=[
                pltpu.VMEM((8, l), jnp.float32),         # running sq-error sum
                pltpu.VMEM((8, l), jnp.float32),         # running TV sum
            ],
        ),
        compiler_params=pltpu.CompilerParams(
            dimension_semantics=("parallel", "arbitrary"),
            vmem_limit_bytes=vmem_limit,
        ),
        cost_estimate=cost,
    )(o2, t2)

    # Each half's block already holds its (1-alpha)/alpha-mixed partial loss;
    # combining the halves is a plain sum.
    return jnp.sum(res[:, 0, 0])


def _loss_mep_ref(output, target, alpha=0.1):
    """Pure-JAX reference mirroring the PyTorch module exactly."""
    o = output.astype(jnp.float32)
    t = target.astype(jnp.float32)
    mse = jnp.mean((o - t) ** 2)
    b, _, h, w = output.shape
    tv = (jnp.sum(jnp.abs(o[:, :, :-1] - o[:, :, 1:]))
          + jnp.sum(jnp.abs(o[:, :, :, :-1] - o[:, :, :, 1:])))
    tv = tv / (b * h * w)
    return (1.0 - alpha) * mse + alpha * tv


if __name__ == "__main__":
    key = jax.random.PRNGKey(0)

    cases = [
        ((2, 4, 16, 16), {}),                                   # main case
        ((3, 5, 8, 16), {}),                                    # zero-row padding, non-square H/W
        ((4, 8, 16, 16), {}),                                   # dual-half ("parallel") path
        ((4, 8, 16, 16), {"tile_budget_bytes": 8 * 256 * 4}),   # multi-step reduction path
    ]
    for i, (shape, kwargs) in enumerate(cases):
        k1, k2 = jax.random.split(jax.random.fold_in(key, i))
        output = jax.random.normal(k1, shape, dtype=jnp.float32)
        target = jax.random.normal(k2, shape, dtype=jnp.float32)

        loss = loss_mep(output, target, alpha=0.1, **kwargs)
        jax.block_until_ready(loss)

        ref = _loss_mep_ref(output, target, alpha=0.1)
        assert jnp.allclose(loss, ref, rtol=1e-5, atol=1e-5), (shape, loss, ref)

    print("KERNEL_OK")
</pallas_src>

<mosaic_0001>
module attributes {stable_mosaic.version = 11 : i64} {
  func.func @_loss_mep_kernel(%arg0: i32, %arg1: i32, %arg2: memref<8x256xf32, #tpu.memory_space<vmem>>, %arg3: memref<8x256xf32, #tpu.memory_space<vmem>>, %arg4: memref<1x8x128xf32, #tpu.memory_space<vmem>>, %arg5: memref<8x256xf32, #tpu.memory_space<vmem>>, %arg6: memref<8x256xf32, #tpu.memory_space<vmem>>) attributes {dimension_semantics = [#tpu.dimension_semantics<parallel>, #tpu.dimension_semantics<arbitrary>], iteration_bounds = array<i64: 1, 1>, scalar_prefetch = 0 : i64, scratch_operands = 2 : i64, tpu.core_type = #tpu.core_type<tc>, window_params = [{transform_indices = @transform_0, window_bounds = array<i64: 8, 256>}, {transform_indices = @transform_1, window_bounds = array<i64: 8, 256>}, {transform_indices = @transform_2, window_bounds = array<i64: 1, 8, 128>}]} {
    %c0_i32 = arith.constant 0 : i32
    %0 = arith.cmpi eq, %arg1, %c0_i32 : i32
    %1 = arith.extui %0 : i1 to i32
    %c0_i32_0 = arith.constant 0 : i32
    %2 = arith.cmpi ne, %1, %c0_i32_0 : i32
    scf.if %2 {
      %cst_20 = arith.constant 0.000000e+00 : f32
      %52 = vector.broadcast %cst_20 : f32 to vector<8x256xf32>
      %c0_21 = arith.constant 0 : index
      %c0_22 = arith.constant 0 : index
      %53 = vector.load %arg5[%c0_21, %c0_22] : memref<8x256xf32, #tpu.memory_space<vmem>>, vector<8x256xf32>
      tpu.vector_store %arg5[%c0_21, %c0_22], %52 {strides = array<i32>} : memref<8x256xf32, #tpu.memory_space<vmem>>, vector<8x256xf32>,
      %cst_23 = arith.constant 0.000000e+00 : f32
      %54 = vector.broadcast %cst_23 : f32 to vector<8x256xf32>
      %c0_24 = arith.constant 0 : index
      %c0_25 = arith.constant 0 : index
      %55 = vector.load %arg6[%c0_24, %c0_25] : memref<8x256xf32, #tpu.memory_space<vmem>>, vector<8x256xf32>
      tpu.vector_store %arg6[%c0_24, %c0_25], %54 {strides = array<i32>} : memref<8x256xf32, #tpu.memory_space<vmem>>, vector<8x256xf32>,
    } else {
    }
    %c0 = arith.constant 0 : index
    %c0_1 = arith.constant 0 : index
    %3 = vector.load %arg2[%c0, %c0_1] : memref<8x256xf32, #tpu.memory_space<vmem>>, vector<8x256xf32>
    %c0_2 = arith.constant 0 : index
    %c0_3 = arith.constant 0 : index
    %4 = vector.load %arg3[%c0_2, %c0_3] : memref<8x256xf32, #tpu.memory_space<vmem>>, vector<8x256xf32>
    %5 = arith.subf %3, %4 : vector<8x256xf32>
    %6 = arith.mulf %5, %5 : vector<8x256xf32>
    %c255_i32 = arith.constant 255 : i32
    %7 = tpu.dynamic_rotate %3 by %c255_i32 dim 1 : vector<8x256xf32>, i32 -> vector<8x256xf32>
    %c240_i32 = arith.constant 240 : i32
    %8 = tpu.dynamic_rotate %3 by %c240_i32 dim 1 : vector<8x256xf32>, i32 -> vector<8x256xf32>
    %9 = tpu.iota {dimensions = array<i32: 1>} : vector<1x256xi32>
    %c16_i32 = arith.constant 16 : i32
    %c0_i32_4 = arith.constant 0 : i32
    %10 = arith.cmpi eq, %c16_i32, %c0_i32_4 : i32
    %c1_i32 = arith.constant 1 : i32
    %11 = arith.select %10, %c1_i32, %c16_i32 : i32
    %12 = vector.broadcast %11 : i32 to vector<1x256xi32>
    %13 = arith.remsi %9, %12 : vector<1x256xi32>
    %c0_i32_5 = arith.constant 0 : i32
    %14 = vector.broadcast %c0_i32_5 : i32 to vector<1x256xi32>
    %15 = arith.cmpi ne, %13, %14 : vector<1x256xi32>
    %c0_i32_6 = arith.constant 0 : i32
    %16 = vector.broadcast %c0_i32_6 : i32 to vector<1x256xi32>
    %17 = arith.cmpi slt, %13, %16 : vector<1x256xi32>
    %c0_i32_7 = arith.constant 0 : i32
    %18 = arith.cmpi slt, %11, %c0_i32_7 : i32
    %19 = vector.broadcast %18 : i1 to vector<1x256xi1>
    %20 = vector.broadcast %19 : vector<1x256xi1> to vector<1x256xi1>
    %21 = arith.xori %17, %20 : vector<1x256xi1>
    %22 = arith.andi %21, %15 : vector<1x256xi1>
    %23 = vector.broadcast %11 : i32 to vector<1x256xi32>
    %24 = arith.addi %13, %23 : vector<1x256xi32>
    %25 = arith.select %22, %24, %13 : vector<1x256xi1>, vector<1x256xi32>
    %c15_i32 = arith.constant 15 : i32
    %26 = vector.broadcast %c15_i32 : i32 to vector<1x256xi32>
    %27 = arith.cmpi ne, %25, %26 : vector<1x256xi32>
    %c240_i32_8 = arith.constant 240 : i32
    %28 = vector.broadcast %c240_i32_8 : i32 to vector<1x256xi32>
    %29 = arith.cmpi slt, %9, %28 : vector<1x256xi32>
    %30 = arith.subf %3, %7 : vector<8x256xf32>
    %31 = math.absf %30 : vector<8x256xf32>
    %cst = arith.constant 0.000000e+00 : f32
    %32 = vector.shape_cast %27 : vector<1x256xi1> to vector<1x256xi1>
    %33 = vector.broadcast %32 : vector<1x256xi1> to vector<8x256xi1>
    %34 = vector.broadcast %cst : f32 to vector<8x256xf32>
    %35 = arith.select %33, %31, %34 : vector<8x256xi1>, vector<8x256xf32>
    %36 = arith.subf %3, %8 : vector<8x256xf32>
    %37 = math.absf %36 : vector<8x256xf32>
    %cst_9 = arith.constant 0.000000e+00 : f32
    %38 = vector.shape_cast %29 : vector<1x256xi1> to vector<1x256xi1>
    %39 = vector.broadcast %38 : vector<1x256xi1> to vector<8x256xi1>
    %40 = vector.broadcast %cst_9 : f32 to vector<8x256xf32>
    %41 = arith.select %39, %37, %40 : vector<8x256xi1>, vector<8x256xf32>
    %42 = arith.addf %35, %41 : vector<8x256xf32>
    %c0_10 = arith.constant 0 : index
    %c0_11 = arith.constant 0 : index
    %43 = vector.load %arg5[%c0_10, %c0_11] : memref<8x256xf32, #tpu.memory_space<vmem>>, vector<8x256xf32>
    %44 = arith.addf %43, %6 : vector<8x256xf32>
    %c0_12 = arith.constant 0 : index
    %c0_13 = arith.constant 0 : index
    %45 = vector.load %arg5[%c0_12, %c0_13] : memref<8x256xf32, #tpu.memory_space<vmem>>, vector<8x256xf32>
    tpu.vector_store %arg5[%c0_12, %c0_13], %44 {strides = array<i32>} : memref<8x256xf32, #tpu.memory_space<vmem>>, vector<8x256xf32>,
    %c0_14 = arith.constant 0 : index
    %c0_15 = arith.constant 0 : index
    %46 = vector.load %arg6[%c0_14, %c0_15] : memref<8x256xf32, #tpu.memory_space<vmem>>, vector<8x256xf32>
    %47 = arith.addf %46, %42 : vector<8x256xf32>
    %c0_16 = arith.constant 0 : index
    %c0_17 = arith.constant 0 : index
    %48 = vector.load %arg6[%c0_16, %c0_17] : memref<8x256xf32, #tpu.memory_space<vmem>>, vector<8x256xf32>
    tpu.vector_store %arg6[%c0_16, %c0_17], %47 {strides = array<i32>} : memref<8x256xf32, #tpu.memory_space<vmem>>, vector<8x256xf32>,
    %c0_i32_18 = arith.constant 0 : i32
    %49 = arith.cmpi eq, %arg1, %c0_i32_18 : i32
    %50 = arith.extui %49 : i1 to i32
    %c0_i32_19 = arith.constant 0 : i32
    %51 = arith.cmpi ne, %50, %c0_i32_19 : i32
    scf.if %51 {
      %c0_20 = arith.constant 0 : index
      %c0_21 = arith.constant 0 : index
      %52 = vector.load %arg5[%c0_20, %c0_21] : memref<8x256xf32, #tpu.memory_space<vmem>>, vector<8x256xf32>
      %53 = vector.shape_cast %52 : vector<8x256xf32> to vector<1x8x256xf32>
      %cst_22 = arith.constant dense<0.000000e+00> : vector<1xf32>
      %54 = vector.multi_reduction <add>, %53, %cst_22 [1, 2] : vector<1x8x256xf32> to vector<1xf32>
      %55 = vector.shape_cast %54 : vector<1xf32> to vector<1x1x1xf32>
      %56 = vector.extract %55[0, 0, 0] : f32 from vector<1x1x1xf32>
      %c0_23 = arith.constant 0 : index
      %c0_24 = arith.constant 0 : index
      %57 = vector.load %arg6[%c0_23, %c0_24] : memref<8x256xf32, #tpu.memory_space<vmem>>, vector<8x256xf32>
      %58 = vector.shape_cast %57 : vector<8x256xf32> to vector<1x8x256xf32>
      %cst_25 = arith.constant dense<0.000000e+00> : vector<1xf32>
      %59 = vector.multi_reduction <add>, %58, %cst_25 [1, 2] : vector<1x8x256xf32> to vector<1xf32>
      %60 = vector.shape_cast %59 : vector<1xf32> to vector<1x1x1xf32>
      %61 = vector.extract %60[0, 0, 0] : f32 from vector<1x1x1xf32>
      %cst_26 = arith.constant 0.899999976 : f32
      %62 = arith.mulf %cst_26, %56 : f32
      %cst_27 = arith.constant 4.8828125E-4 : f32
      %63 = arith.mulf %62, %cst_27 : f32
      %cst_28 = arith.constant 1.000000e-01 : f32
      %64 = arith.mulf %cst_28, %61 : f32
      %cst_29 = arith.constant 0.001953125 : f32
      %65 = arith.mulf %64, %cst_29 : f32
      %66 = arith.addf %63, %65 : f32
      %cst_30 = arith.constant 0.000000e+00 : f32
      %67 = vector.broadcast %cst_30 : f32 to vector<1x8x128xf32>
      %68 = vector.broadcast %66 : f32 to vector<1x8x128xf32>
      %69 = arith.addf %67, %68 : vector<1x8x128xf32>
      %c0_31 = arith.constant 0 : index
      %c0_32 = arith.constant 0 : index
      %c0_33 = arith.constant 0 : index
      %70 = vector.load %arg4[%c0_31, %c0_32, %c0_33] : memref<1x8x128xf32, #tpu.memory_space<vmem>>, vector<1x8x128xf32>
      tpu.vector_store %arg4[%c0_31, %c0_32, %c0_33], %69 {strides = array<i32>} : memref<1x8x128xf32, #tpu.memory_space<vmem>>, vector<1x8x128xf32>,
    } else {
    }
    return
  }
  func.func @transform_0(%arg0: i32, %arg1: i32) -> (i32, i32) {
    %c1_i32 = arith.constant 1 : i32
    %0 = arith.muli %arg0, %c1_i32 : i32
    %1 = arith.addi %0, %arg1 : i32
    %c0_i32 = arith.constant 0 : i32
    %c0_i32_0 = arith.constant 0 : i32
    return %1, %c0_i32 : i32, i32
  }
  func.func @transform_1(%arg0: i32, %arg1: i32) -> (i32, i32) {
    %c1_i32 = arith.constant 1 : i32
    %0 = arith.muli %arg0, %c1_i32 : i32
    %1 = arith.addi %0, %arg1 : i32
    %c0_i32 = arith.constant 0 : i32
    %c0_i32_0 = arith.constant 0 : i32
    return %1, %c0_i32 : i32, i32
  }
  func.func @transform_2(%arg0: i32, %arg1: i32) -> (i32, i32, i32) {
    %c0_i32 = arith.constant 0 : i32
    %c0_i32_0 = arith.constant 0 : i32
    %c0_i32_1 = arith.constant 0 : i32
    return %arg0, %c0_i32, %c0_i32_0 : i32, i32, i32
  }
}

</mosaic_0001>

<bundles_post_ra>
// kernel: tpu_custom_call.1
= control target key start
LH: loop header
LB: loop body
LE: loop exit
PB: predicated region body
PF: predicated region fallthrough
CT: control target
= control target key end

     0   :  { %7 = vsyncpa [#allocation5], 0  ;;  %s329_s0 = inlined_call_operand.hbm [shape: f32[8,256], index: 0, kind: input, shape index: {}]   ;;  %s330_s1 = inlined_call_operand.hbm [shape: f32[8,256], index: 1, kind: input, shape index: {}]   ;;  %s331_s2 = inlined_call_operand.hbm [shape: f32[1,8,128], index: 2, kind: output, shape index: {}]  }
   0x1   :  { %8 = vsyncpa [#allocation8], 0 }
   0x2   :  { %9 = vsyncpa [#allocation6], 0  ;;  %s273_s9 = smov [#allocation4]   ;;  %s274_s11 = smov [#allocation7]  }
   0x3   :  { %s20_s10 = sshll.u32 %s273_s9, 4  ;;  %s34_s12 = sshll.u32 %s274_s11, 4  ;;  %s21_s10 = int_to_ptr.vmem [resolvable:$true] %s20_s10  ;;  %s35_s12 = int_to_ptr.vmem [resolvable:$true] %s34_s12 }
   0x4   :  { %s201_s15 = scalar_lea.hbm %s329_s0, 256 }
   0x5   :  { %p202_p0 = scmp.ne.s32.totalorder %s329_s0, %s201_s15  ;;  %p205_p1 = scmp.lt.u32.totalorder %s201_s15, %s329_s0 }
   0x7   :  { %p207_p2 = pnand %p205_p1, %p202_p0 }
   0x9   :  { %210 = shalt.err (!%p207_p2)
}
   0xa   :  { %s211_s20 = scalar_lea.vmem %s21_s10, 256  ;;  %p216_p4 = scmp.lt.s32.totalorder %s21_s10, %s21_s10 }
   0xb   :  { %p212_p3 = scmp.ne.s32.totalorder %s21_s10, %s211_s20  ;;  %p217_p5 = scmp.lt.s32.totalorder %s211_s20, %s211_s20 }
   0xd   :  { %p218_p6 = por %p217_p5, %p216_p4 }
   0xf   :  { %p219_p7 = pnand %p218_p6, %p212_p3 }
  0x11   :  { %222 = shalt.err (!%p219_p7)
}
  0x12   :  { %23 = dma.hbm_to_vmem [thread:$0]  %s329_s0, 256, %s21_s10, [#allocation5]  }
  0x13   :  { %s223_s25 = scalar_lea.hbm %s330_s1, 256 }
  0x14   :  { %p224_p8 = scmp.ne.s32.totalorder %s330_s1, %s223_s25  ;;  %p227_p9 = scmp.lt.u32.totalorder %s223_s25, %s330_s1 }
  0x16   :  { %p229_p10 = pnand %p227_p9, %p224_p8 }
  0x18   :  { %232 = shalt.err (!%p229_p10)
}
  0x19   :  { %s233_s30 = scalar_lea.vmem %s35_s12, 256  ;;  %p238_p12 = scmp.lt.s32.totalorder %s35_s12, %s35_s12 }
  0x1a   :  { %p234_p11 = scmp.ne.s32.totalorder %s35_s12, %s233_s30  ;;  %p239_p13 = scmp.lt.s32.totalorder %s233_s30, %s233_s30 }
  0x1c   :  { %p240_p0 = por %p239_p13, %p238_p12 }
  0x1e   :  { %p241_p1 = pnand %p240_p0, %p234_p11 }
  0x20   :  { %244 = shalt.err (!%p241_p1)
}
  0x21   :  { %37 = dma.hbm_to_vmem [thread:$0]  %s330_s1, 256, %s35_s12, [#allocation8]  }
  0x22   :  { %267 = dma.done.wait [#allocation5], 256  }
  0x23   :  { %268 = vsyncadd [#allocation5], 4294967040 }
  0x24   :  { %269 = dma.done.wait [#allocation8], 256  }
  0x25   :  { %270 = vsyncadd [#allocation8], 4294967040  ;;  %v54_v0 = vld [vmem:[#allocation4] sm:$0xff]  ;;  %s275_s4 = smov 112   ;;  %s276_s5 = smov 127   ;;  %v55_v1 = vld [vmem:[#allocation4 + $0x8] sm:$0xff]  ;;  %v66_v9 = vlaneseq }
  0x26   :  { %71 = vrot.lane.b32.xlu1 %v54_v0, %s275_s4  ;;  %62 = vrot.lane.b32.xlu0 %v54_v0, %s276_s5  ;;  %v56_v2 = vld [vmem:[#allocation7] sm:$0xff]  ;;  %v57_v3 = vld [vmem:[#allocation7 + $0x8] sm:$0xff]  ;;  %s277_s11 = smov [#allocation9]  }
  0x27   :  { %v58_v4 = vsub.f32 %v54_v0, %v56_v2  ;;  %v59_v5 = vsub.f32 %v55_v1, %v57_v3  ;;  %v67_v10 = vand.u32 127, %v66_v9  ;;  %s182_s12 = sshll.u32 %s277_s11, 4  ;;  %s183_s12 = int_to_ptr.vmem [resolvable:$true] %s182_s12 }
  0x28   :  { %s245_s14 = scalar_lea.vmem %s183_s12, 128  ;;  %p250_p3 = scmp.lt.s32.totalorder %s183_s12, %s183_s12 }
  0x29   :  { %v60_v6 = vmul.f32 %v58_v4, %v58_v4  ;;  %v61_v7 = vmul.f32 %v59_v5, %v59_v5  ;;  %v78_v11 = vadd.s32 128, %v67_v10  ;;  %vm75_vm0 = vcmp.lt.s32.totalorder %v67_v10, 112  ;;  %p246_p2 = scmp.ne.s32.totalorder %s183_s12, %s245_s14  ;;  %p251_p4 = scmp.lt.s32.totalorder %s245_s14, %s245_s14 }
  0x2a   :  { %73 = vrot.lane.b32.xlu1 %v55_v1, %s275_s4  ;;  %64 = vrot.lane.b32.xlu0 %v55_v1, %s276_s5  ;;  %vm68_vm1 = vcmp.lt.s32.totalorder %v67_v10, 127  ;;  %v83_v14 = vand.u32 15, %v67_v10 }
  0x2b   :  { %v146_v8 = vadd.f32 %v61_v7, %v60_v6  ;;  %v90_v15 = vand.u32 15, %v78_v11  ;;  %vm106_vm4 = vcmp.lt.s32.totalorder %v78_v11, 240  ;;  %p252_p5 = por %p251_p4, %p250_p3 }
  0x2c   :  { %vm103_vm2 = vcmp.ne.s32.totalorder %v83_v14, 15 }
  0x2d   :  { %vm104_vm3 = vcmp.ne.s32.totalorder %v90_v15, 15  ;;  %p253_p6 = pnand %p252_p5, %p246_p2 }
  0x49   :  { %147 = vadd.xlane.f32.xlu0 %v146_v8 }
  0x98   :  { %v72_v12 = vpop.permute.xlu1 %71  ;;  %v63_v13 = vpop.permute.xlu0 %62 }
  0x9c   :  { %v74_v16 = vpop.permute.xlu1 %73  ;;  %v65_v17 = vpop.permute.xlu0 %64 }
  0x9d   :  { %v76_v18 = vsel %vm75_vm0, %v72_v12, %v74_v16  ;;  %v77_v19 = vsel %vm75_vm0, %v74_v16, %v72_v12  ;;  %v69_v20 = vsel %vm68_vm1, %v63_v13, %v65_v17  ;;  %v70_v21 = vsel %vm68_vm1, %v65_v17, %v63_v13 }
  0x9e   :  { %v117_v22 = vsub.f32 %v54_v0, %v76_v18  ;;  %v118_v23 = vsub.f32 %v55_v1, %v77_v19  ;;  %v107_v24 = vsub.f32 %v54_v0, %v69_v20  ;;  %v108_v25 = vsub.f32 %v55_v1, %v70_v21 }
  0xa0   :  { %v119_v26 = vand.u32 2147483647, %v117_v22  ;;  %v120_v27 = vand.u32 2147483647, %v118_v23  ;;  %v109_v28 = vand.u32 2147483647, %v107_v24 }
  0xa1   :  { %v110_v29 = vand.u32 2147483647, %v108_v25 }
  0xa2   :  { %v115_v30 = vsel %vm103_vm2, %v109_v28, 0.0  ;;  %v126_v31 = vsel %vm106_vm4, %v120_v27, 0.0 }
  0xa3   :  { %v116_v32 = vsel %vm104_vm3, %v110_v29, 0.0  ;;  %v127_v33 = vadd.f32 %v119_v26, %v115_v30 }
  0xa4   :  { %v128_v34 = vadd.f32 %v126_v31, %v116_v32 }
  0xa6   :  { %v158_v35 = vadd.f32 %v128_v34, %v127_v33 }
  0xa8   :  { %159 = vadd.xlane.f32.xlu1 %v158_v35 }
  0xd6   :  { %v148_v36 = vpop.xlane.xlu0 %147 }
  0xd7   :  { %v149_v37 = vrot.slane %v148_v36, 4 }
  0xd9   :  { %v150_v38 = vadd.f32 %v149_v37, %v148_v36 }
  0xdb   :  { %v151_v39 = vrot.slane %v150_v38, 2 }
  0xdd   :  { %v152_v40 = vadd.f32 %v151_v39, %v150_v38 }
  0xdf   :  { %v153_v41 = vrot.slane %v152_v40, 1 }
  0xe1   :  { %v154_v42 = vadd.f32 %v153_v41, %v152_v40 }
  0xe3   :  { %192 = vpush %v154_v42 }
 0x114   :  { %s193_s1 = spop %192 }
 0x115   :  { %s168_s6 = smul.f32 0.9, %s193_s1 }
 0x117   :  { %s169_s9 = smul.f32 0.00048828125, %s168_s6 }
 0x135   :  { %v160_v43 = vpop.xlane.xlu1 %159 }
 0x136   :  { %v161_v44 = vrot.slane %v160_v43, 4 }
 0x138   :  { %v162_v45 = vadd.f32 %v161_v44, %v160_v43 }
 0x13a   :  { %v163_v46 = vrot.slane %v162_v45, 2 }
 0x13c   :  { %v164_v47 = vadd.f32 %v163_v46, %v162_v45 }
 0x13e   :  { %v165_v48 = vrot.slane %v164_v47, 1 }
 0x140   :  { %v166_v49 = vadd.f32 %v165_v48, %v164_v47 }
 0x142   :  { %194 = vpush %v166_v49 }
 0x173   :  { %s195_s7 = spop %194 }
 0x174   :  { %s170_s8 = smul.f32 0.1, %s195_s7 }
 0x176   :  { %s171_s10 = smul.f32 0.001953125, %s170_s8 }
 0x178   :  { %s172_s13 = sadd.f32 %s171_s10, %s169_s9 }
 0x17a   :  { %v173_v50 = vstv %s172_s13 }
 0x17b   :  { %175 = vst [vmem:[#allocation9] sm:$0xff] %v173_v50 }
 0x17c   :  { %256 = shalt.err (!%p253_p6)
}
 0x17d   :  { %s257_s17 = scalar_lea.hbm %s331_s2, 128 }
 0x17e   :  { %p258_p7 = scmp.ne.s32.totalorder %s331_s2, %s257_s17  ;;  %p261_p8 = scmp.lt.u32.totalorder %s257_s17, %s331_s2 }
 0x180   :  { %p263_p9 = pnand %p261_p8, %p258_p7 }
 0x182   :  { %266 = shalt.err (!%p263_p9)
}
 0x183   :  { %185 = dma.vmem_to_hbm [thread:$0]  %s183_s12, 128, %s331_s2, [#allocation6]  }
 0x184   :  { %271 = dma.done.wait [#allocation6], 128  }
 0x185   :  { %272 = vsyncadd [#allocation6], 4294967168 }
 0x186   :  { %189 = vsyncpa [#allocation5], 1 }
 0x187   :  { %190 = vsyncpa [#allocation8], 1 }
 0x188   :  { %191 = vsyncpa [#allocation6], 1 }

</bundles_post_ra>
